<compile_context>
chip_gen: v7x
topology: tpu7x:2x2x1
jax: 0.10.0
libtpu: 0.0.40
codegen_flags: <defaults>
</compile_context>

<pallas_src>
import functools

import jax
import jax.numpy as jnp
from jax import lax
from jax.experimental import pallas as pl
from jax.experimental.pallas import tpu as pltpu


def _pool_sum_kernel(x_ref, o_ref, acc_ref, *, s_total, ts, chunked, ragged):
    """Accumulate spatial sums of x (N, tc, ts) into acc; emit (N, tc) sums."""
    si = pl.program_id(1)
    last = pl.num_programs(1) - 1

    @pl.when(si == 0)
    def _init():
        acc_ref[...] = jnp.zeros_like(acc_ref)

    if not chunked:
        # Single full-extent spatial block (ts == S, S not a 128-multiple):
        # exact, no masking needed, one cross-lane reduce total.
        acc_ref[...] += jnp.sum(x_ref[...], axis=-1, keepdims=True,
                                dtype=jnp.float32)
    else:
        chunks = ts // 128
        unroll = chunks <= 16

        def accumulate(masked):
            def body(j, carry):
                off = pl.multiple_of(j * 128, 128)
                chunk = x_ref[:, :, pl.ds(off, 128)].astype(jnp.float32)
                if masked:
                    lane = lax.broadcasted_iota(jnp.int32, chunk.shape, 2)
                    valid = (si * ts + off + lane) < s_total
                    chunk = jnp.where(valid, chunk, 0.0)
                acc_ref[...] += chunk          # lane-aligned VALU adds only
                return carry
            lax.fori_loop(0, chunks, body, 0, unroll=unroll)

        if ragged:
            # Only the last spatial block needs masking; keep the hot loop lean.
            @pl.when(si != last)
            def _full():
                accumulate(masked=False)

            @pl.when(si == last)
            def _tail():
                accumulate(masked=True)
        else:
            accumulate(masked=False)

    @pl.when(si == last)
    def _finalize():
        # Single deferred cross-lane (XLU) reduce per channel block.
        o_ref[...] = jnp.sum(acc_ref[...], axis=-1)


def _choose_channel_tile(n, c, itemsize, tile_bytes):
    """Channel tile tc: tc == C or a 128-multiple divisor of C.

    Prefers >= 2 channel blocks (so the 'parallel' grid axis can span both
    v7x TensorCores) and guarantees the 128-lane slab floor fits the per-buffer
    budget whenever a valid split exists.
    """
    valid = sorted({d for d in range(1, c + 1)
                    if c % d == 0 and (d == c or d % 128 == 0)},
                   reverse=True)

    def lane_floor_bytes(tc):
        return n * tc * 128 * itemsize

    fitting = [tc for tc in valid if lane_floor_bytes(tc) <= tile_bytes]
    if not fitting:
        return valid[-1]                      # best effort for huge N*C
    multi = [tc for tc in fitting if c // tc >= 2]
    return multi[0] if multi else fitting[0]


def classification_head(x, weight, bias, *,
                        tile_bytes=16 * 1024 * 1024,
                        vmem_limit_bytes=48 * 1024 * 1024):
    """x: (N, C, D, H, W); weight: (num_classes, C); bias: (num_classes,)."""
    n, c, d, h, w = x.shape
    k = weight.shape[0]
    s = d * h * w

    x_flat = x.reshape(n, c, s)               # contiguous -> free reshape

    itemsize = jnp.dtype(x.dtype).itemsize

    # ---- channel tiling (parallel axis; also guards the 128-lane floor) ----
    tc = _choose_channel_tile(n, c, itemsize, tile_bytes)
    c_blocks = c // tc

    # ---- spatial tiling: ts is a 128-multiple, or the full extent S ----
    if n * tc * s * itemsize <= tile_bytes or s <= 128:
        ts = s
    else:
        ts_budget = tile_bytes // (n * tc * itemsize)
        ts = max(128, min((ts_budget // 128) * 128, (s // 128) * 128))
    s_blocks = (s + ts - 1) // ts
    chunked = (ts % 128 == 0)
    ragged = (s % ts != 0)                    # last tile masked in-kernel

    kernel = functools.partial(_pool_sum_kernel, s_total=s, ts=ts,
                               chunked=chunked, ragged=ragged)
    acc_lanes = 128 if chunked else 1

    pooled = pl.pallas_call(
        kernel,
        out_shape=jax.ShapeDtypeStruct((n, c), jnp.float32),
        grid_spec=pltpu.PrefetchScalarGridSpec(
            num_scalar_prefetch=0,
            grid=(c_blocks, s_blocks),
            in_specs=[
                pl.BlockSpec((n, tc, ts), lambda ci, si: (0, ci, si)),
            ],
            out_specs=pl.BlockSpec((n, tc), lambda ci, si: (0, ci)),
            scratch_shapes=[pltpu.VMEM((n, tc, acc_lanes), jnp.float32)],
        ),
        compiler_params=pltpu.CompilerParams(
            dimension_semantics=("parallel", "arbitrary"),
            vmem_limit_bytes=vmem_limit_bytes,
        ),
    )(x_flat)

    # Tiny epilogue in plain JAX: mean scale + (N,C)x(C,K) + bias. Runs once
    # over (N, C) / (N, K) elements -> negligible vs. the streamed reduction,
    # and keeps the f32 weight out of VMEM during the memory-bound loop.
    out_dtype = jnp.result_type(x.dtype, weight.dtype, bias.dtype)
    mean = pooled * (1.0 / float(s))
    logits = mean @ weight.astype(jnp.float32).T + bias.astype(jnp.float32)
    return logits.astype(out_dtype)


if __name__ == "__main__":
    key = jax.random.PRNGKey(0)
    kx, kw, kb = jax.random.split(key, 3)

    # Small shapes consistent with the module; S = 4*6*5 = 120 (< 128)
    # exercises the full-extent single-block path (no padding, no masking).
    N, C, D, H, W = 2, 32, 4, 6, 5
    NUM_CLASSES = 8

    x = jax.random.normal(kx, (N, C, D, H, W), dtype=jnp.float32)
    weight = jax.random.normal(kw, (NUM_CLASSES, C), dtype=jnp.float32) * 0.05
    bias = jax.random.normal(kb, (NUM_CLASSES,), dtype=jnp.float32) * 0.05

    logits = jax.block_until_ready(classification_head(x, weight, bias))
    ref = jnp.mean(x, axis=(2, 3, 4)) @ weight.T + bias
    assert logits.shape == (N, NUM_CLASSES)
    assert jnp.allclose(logits, ref, atol=1e-5, rtol=1e-5), (
        float(jnp.max(jnp.abs(logits - ref))))

    # Second config exercises the streamed / chunked / masked-ragged-tail path
    # (S = 320 -> ts = 128, 3 spatial blocks, last tile masked) without any
    # wrapper-side padding of x.
    D2, H2, W2 = 4, 10, 8
    x2 = jax.random.normal(kx, (N, C, D2, H2, W2), dtype=jnp.float32)
    logits2 = jax.block_until_ready(
        classification_head(x2, weight, bias, tile_bytes=32 * 1024))
    ref2 = jnp.mean(x2, axis=(2, 3, 4)) @ weight.T + bias
    assert jnp.allclose(logits2, ref2, atol=1e-5, rtol=1e-5), (
        float(jnp.max(jnp.abs(logits2 - ref2))))

    print("KERNEL_OK")
</pallas_src>

<mosaic_0001>
module attributes {stable_mosaic.version = 11 : i64} {
  func.func @_pool_sum_kernel(%arg0: i32, %arg1: i32, %arg2: memref<2x32x120xf32, #tpu.memory_space<vmem>>, %arg3: memref<2x32xf32, #tpu.memory_space<vmem>>, %arg4: memref<2x32x1xf32, #tpu.memory_space<vmem>>) attributes {dimension_semantics = [#tpu.dimension_semantics<parallel>, #tpu.dimension_semantics<arbitrary>], iteration_bounds = array<i64: 1, 1>, scalar_prefetch = 0 : i64, scratch_operands = 1 : i64, tpu.core_type = #tpu.core_type<tc>, window_params = [{transform_indices = @transform_0, window_bounds = array<i64: 2, 32, 120>}, {transform_indices = @transform_1, window_bounds = array<i64: 2, 32>}]} {
    %c0_i32 = arith.constant 0 : i32
    %0 = arith.cmpi eq, %arg1, %c0_i32 : i32
    %1 = arith.extui %0 : i1 to i32
    %c0_i32_0 = arith.constant 0 : i32
    %2 = arith.cmpi ne, %1, %c0_i32_0 : i32
    scf.if %2 {
      %cst_11 = arith.constant 0.000000e+00 : f32
      %12 = vector.broadcast %cst_11 : f32 to vector<2x32x1xf32>
      %c0_12 = arith.constant 0 : index
      %c0_13 = arith.constant 0 : index
      %c0_14 = arith.constant 0 : index
      %13 = vector.load %arg4[%c0_12, %c0_13, %c0_14] : memref<2x32x1xf32, #tpu.memory_space<vmem>>, vector<2x32x1xf32>
      tpu.vector_store %arg4[%c0_12, %c0_13, %c0_14], %12 {strides = array<i32>} : memref<2x32x1xf32, #tpu.memory_space<vmem>>, vector<2x32x1xf32>,
    } else {
    }
    %c0 = arith.constant 0 : index
    %c0_1 = arith.constant 0 : index
    %c0_2 = arith.constant 0 : index
    %3 = vector.load %arg4[%c0, %c0_1, %c0_2] : memref<2x32x1xf32, #tpu.memory_space<vmem>>, vector<2x32x1xf32>
    %c0_3 = arith.constant 0 : index
    %c0_4 = arith.constant 0 : index
    %c0_5 = arith.constant 0 : index
    %4 = vector.load %arg2[%c0_3, %c0_4, %c0_5] : memref<2x32x120xf32, #tpu.memory_space<vmem>>, vector<2x32x120xf32>
    %cst = arith.constant dense<0.000000e+00> : vector<2x32xf32>
    %5 = vector.multi_reduction <add>, %4, %cst [2] : vector<2x32x120xf32> to vector<2x32xf32>
    %6 = vector.shape_cast %5 : vector<2x32xf32> to vector<2x32x1xf32>
    %7 = arith.addf %3, %6 : vector<2x32x1xf32>
    %c0_6 = arith.constant 0 : index
    %c0_7 = arith.constant 0 : index
    %c0_8 = arith.constant 0 : index
    %8 = vector.load %arg4[%c0_6, %c0_7, %c0_8] : memref<2x32x1xf32, #tpu.memory_space<vmem>>, vector<2x32x1xf32>
    tpu.vector_store %arg4[%c0_6, %c0_7, %c0_8], %7 {strides = array<i32>} : memref<2x32x1xf32, #tpu.memory_space<vmem>>, vector<2x32x1xf32>,
    %c0_i32_9 = arith.constant 0 : i32
    %9 = arith.cmpi eq, %arg1, %c0_i32_9 : i32
    %10 = arith.extui %9 : i1 to i32
    %c0_i32_10 = arith.constant 0 : i32
    %11 = arith.cmpi ne, %10, %c0_i32_10 : i32
    scf.if %11 {
      %c0_11 = arith.constant 0 : index
      %c0_12 = arith.constant 0 : index
      %c0_13 = arith.constant 0 : index
      %12 = vector.load %arg4[%c0_11, %c0_12, %c0_13] : memref<2x32x1xf32, #tpu.memory_space<vmem>>, vector<2x32x1xf32>
      %cst_14 = arith.constant dense<0.000000e+00> : vector<2x32xf32>
      %13 = vector.multi_reduction <add>, %12, %cst_14 [2] : vector<2x32x1xf32> to vector<2x32xf32>
      %c0_15 = arith.constant 0 : index
      %c0_16 = arith.constant 0 : index
      %14 = vector.load %arg3[%c0_15, %c0_16] : memref<2x32xf32, #tpu.memory_space<vmem>>, vector<2x32xf32>
      tpu.vector_store %arg3[%c0_15, %c0_16], %13 {strides = array<i32>} : memref<2x32xf32, #tpu.memory_space<vmem>>, vector<2x32xf32>,
    } else {
    }
    return
  }
  func.func @transform_0(%arg0: i32, %arg1: i32) -> (i32, i32, i32) {
    %c0_i32 = arith.constant 0 : i32
    %c0_i32_0 = arith.constant 0 : i32
    return %c0_i32, %arg0, %arg1 : i32, i32, i32
  }
  func.func @transform_1(%arg0: i32, %arg1: i32) -> (i32, i32) {
    %c0_i32 = arith.constant 0 : i32
    %c0_i32_0 = arith.constant 0 : i32
    return %c0_i32, %arg0 : i32, i32
  }
}

</mosaic_0001>

<bundles_post_ra>
// kernel: tpu_custom_call.1
= control target key start
LH: loop header
LB: loop body
LE: loop exit
PB: predicated region body
PF: predicated region fallthrough
CT: control target
= control target key end

     0   :  { %6 = vsyncpa [#allocation4], 0  ;;  %s331_s0 = inlined_call_operand.hbm [shape: f32[2,32,120], index: 0, kind: input, shape index: {}]   ;;  %s332_s1 = inlined_call_operand.hbm [shape: f32[2,32], index: 1, kind: output, shape index: {}]  }
   0x1   :  { %7 = vsyncpa [#allocation5], 0  ;;  %s267_s6 = smov [#allocation3]   ;;  %s219_s10 = scalar_lea.hbm %s331_s0, 1024 }
   0x2   :  { %s13_s7 = sshll.u32 %s267_s6, 4  ;;  %p220_p0 = scmp.ne.s32.totalorder %s331_s0, %s219_s10  ;;  %s14_s7 = int_to_ptr.vmem [resolvable:$true] %s13_s7 }
   0x3   :  { %p223_p1 = scmp.lt.u32.totalorder %s219_s10, %s331_s0 }
   0x5   :  { %p225_p2 = pnand %p223_p1, %p220_p0 }
   0x7   :  { %228 = shalt.err (!%p225_p2)
}
   0x8   :  { %s229_s15 = scalar_lea.vmem %s14_s7, 1024  ;;  %p234_p4 = scmp.lt.s32.totalorder %s14_s7, %s14_s7 }
   0x9   :  { %p230_p3 = scmp.ne.s32.totalorder %s14_s7, %s229_s15  ;;  %p235_p5 = scmp.lt.s32.totalorder %s229_s15, %s229_s15 }
   0xb   :  { %p236_p6 = por %p235_p5, %p234_p4 }
   0xd   :  { %p237_p7 = pnand %p236_p6, %p230_p3 }
   0xf   :  { %240 = shalt.err (!%p237_p7)
}
  0x10   :  { %s268_s16 = smov 128   ;;  %s269_s17 = smov 8  }
  0x11   :  { %19 = dma.hbm_to_vmem [thread:$0]  %s331_s0, 1024, %s14_s7, [#allocation4], %s268_s16, %s268_s16, %s269_s17  }
  0x12   :  { %263 = dma.done.wait [#allocation4], 1024  }
  0x13   :  { %264 = vsyncadd [#allocation4], 4294966272  ;;  %vm27_vm0 = vcmask 7168   ;;  %v270_v0 = vmov 0.0   ;;  %vm52_vm1 = vcmask 982016   ;;  %v44_v1 = vld [vmem:[#allocation3] sm:$0xff]  ;;  %v145_v52 = vlaneseq }
  0x14   :  { %28 = vst.msk [vmem:[#allocation2] sm:$0xff] %vm27_vm0, %v270_v0  ;;  %29 = vst.msk [vmem:[#allocation2 + $0x8] sm:$0xff] %vm27_vm0, %v270_v0  ;;  %v45_v2 = vld [vmem:[#allocation3 + $0x8] sm:$0xff]  ;;  %v48_v3 = vld [vmem:[#allocation3 + $0x20] sm:$0xff]  ;;  %v53_v4 = vsel %vm52_vm1, %v44_v1, 0.0  ;;  %v271_v17 = vmov 0  }
  0x15   :  { %30 = vst.msk [vmem:[#allocation2 + $0x10] sm:$0xff] %vm27_vm0, %v270_v0  ;;  %31 = vst.msk [vmem:[#allocation2 + $0x18] sm:$0xff] %vm27_vm0, %v270_v0  ;;  %v65_v5 = vsel %vm52_vm1, %v48_v3, 0.0  ;;  %v49_v6 = vld [vmem:[#allocation3 + $0x28] sm:$0xff]  ;;  %54 = vadd.xlane.f32.xlu0 %v53_v4  ;;  %v56_v7 = vsel %vm52_vm1, %v45_v2, 0.0  ;;  %v46_v9 = vld [vmem:[#allocation3 + $0x10] sm:$0xff]  ;;  %218 = vset.pattern.permute.xlu1 %v271_v17 }
  0x16   :  { %32 = vst.msk [vmem:[#allocation2 + $0x20] sm:$0xff] %vm27_vm0, %v270_v0  ;;  %33 = vst.msk [vmem:[#allocation2 + $0x28] sm:$0xff] %vm27_vm0, %v270_v0  ;;  %66 = vadd.xlane.f32.xlu1 %v65_v5  ;;  %v68_v8 = vsel %vm52_vm1, %v49_v6, 0.0  ;;  %v50_v10 = vld [vmem:[#allocation3 + $0x30] sm:$0xff]  ;;  %v59_v11 = vsel %vm52_vm1, %v46_v9, 0.0  ;;  %v47_v13 = vld [vmem:[#allocation3 + $0x18] sm:$0xff]  ;;  %217 = vset.pattern.permute.xlu0 %v271_v17 }
  0x17   :  { %34 = vst.msk [vmem:[#allocation2 + $0x30] sm:$0xff] %vm27_vm0, %v270_v0  ;;  %35 = vst.msk [vmem:[#allocation2 + $0x38] sm:$0xff] %vm27_vm0, %v270_v0  ;;  %v71_v12 = vsel %vm52_vm1, %v50_v10, 0.0  ;;  %v51_v14 = vld [vmem:[#allocation3 + $0x38] sm:$0xff]  ;;  %v62_v15 = vsel %vm52_vm1, %v47_v13, 0.0  ;;  %v146_v54 = vand.u32 127, %v145_v52 }
  0x18   :  { %v74_v16 = vsel %vm52_vm1, %v51_v14, 0.0  ;;  %v148_v58 = vshrl.u32 %v145_v52, 7  ;;  %vm156_vm2 = vcmask 130112   ;;  %vm163_vm3 = vcmask 195712   ;;  %s272_s0 = smov [#allocation6]  }
  0x19   :  { %57 = vadd.xlane.f32.xlu0 %v56_v7  ;;  %v151_v56 = vadd.s32 4294967288, %v146_v54  ;;  %v158_v57 = vadd.s32 4294967280, %v146_v54  ;;  %v165_v59 = vadd.s32 4294967272, %v146_v54  ;;  %vm170_vm4 = vcmask 261312   ;;  %s202_s20 = sshll.u32 %s272_s0, 4  ;;  %s203_s20 = int_to_ptr.vmem [resolvable:$true] %s202_s20 }
  0x1a   :  { %69 = vadd.xlane.f32.xlu1 %v68_v8  ;;  %v149_v63 = vsub.s32 %v146_v54, %v148_v58  ;;  %vm191_vm5 = vcmask 1041409   ;;  %vm194_vm6 = vcmask 254976   ;;  %s241_s21 = scalar_lea.vmem %s203_s20, 32  ;;  %p246_p9 = scmp.lt.s32.totalorder %s203_s20, %s203_s20 }
  0x1b   :  { %v36_v18 = vld [vmem:[#allocation2] sm:$0xff]  ;;  %v37_v24 = vld [vmem:[#allocation2 + $0x8] sm:$0xff]  ;;  %v154_v61 = vsub.s32 %v151_v56, %v148_v58  ;;  %v161_v62 = vsub.s32 %v158_v57, %v148_v58  ;;  %v168_v0 = vsub.s32 %v165_v59, %v148_v58  ;;  %p242_p8 = scmp.ne.s32.totalorder %s203_s20, %s241_s21  ;;  %p247_p10 = scmp.lt.s32.totalorder %s241_s21, %s241_s21 }
  0x1c   :  { %v38_v30 = vld [vmem:[#allocation2 + $0x10] sm:$0xff]  ;;  %v39_v37 = vld [vmem:[#allocation2 + $0x18] sm:$0xff] }
  0x1d   :  { %60 = vadd.xlane.f32.xlu0 %v59_v11  ;;  %v40_v19 = vld [vmem:[#allocation2 + $0x20] sm:$0xff]  ;;  %v41_v25 = vld [vmem:[#allocation2 + $0x28] sm:$0xff]  ;;  %p248_p11 = por %p247_p10, %p246_p9 }
  0x1e   :  { %72 = vadd.xlane.f32.xlu1 %v71_v12  ;;  %v42_v31 = vld [vmem:[#allocation2 + $0x30] sm:$0xff]  ;;  %v43_v38 = vld [vmem:[#allocation2 + $0x38] sm:$0xff] }
  0x1f   :  { %p249_p12 = pnand %p248_p11, %p242_p8 }
  0x21   :  { %63 = vadd.xlane.f32.xlu0 %v62_v15 }
  0x22   :  { %75 = vadd.xlane.f32.xlu1 %v74_v16 }
  0xa2   :  { %v55_v20 = vpop.xlane.xlu0 %54 }
  0xa3   :  { %v67_v21 = vpop.xlane.xlu1 %66  ;;  %v77_v22 = vadd.f32 %v55_v20, %v36_v18 }
  0xa4   :  { %v81_v23 = vadd.f32 %v67_v21, %v40_v19 }
  0xa5   :  { %86 = vst.msk [vmem:[#allocation2] sm:$0xff] %vm27_vm0, %v77_v22 }
  0xa6   :  { %90 = vst.msk [vmem:[#allocation2 + $0x20] sm:$0xff] %vm27_vm0, %v81_v23  ;;  %v58_v26 = vpop.xlane.xlu0 %57 }
  0xa7   :  { %v70_v27 = vpop.xlane.xlu1 %69  ;;  %v78_v28 = vadd.f32 %v58_v26, %v37_v24 }
  0xa8   :  { %v82_v29 = vadd.f32 %v70_v27, %v41_v25 }
  0xa9   :  { %87 = vst.msk [vmem:[#allocation2 + $0x8] sm:$0xff] %vm27_vm0, %v78_v28 }
  0xaa   :  { %91 = vst.msk [vmem:[#allocation2 + $0x28] sm:$0xff] %vm27_vm0, %v82_v29  ;;  %v61_v32 = vpop.xlane.xlu0 %60 }
  0xab   :  { %v73_v33 = vpop.xlane.xlu1 %72  ;;  %v79_v34 = vadd.f32 %v61_v32, %v38_v30 }
  0xac   :  { %v83_v35 = vadd.f32 %v73_v33, %v42_v31  ;;  %v97_v36 = vld [vmem:[#allocation2] sm:$0xff] }
  0xad   :  { %122 = vperm.xlu0 %217, %v97_v36   ;;  %88 = vst.msk [vmem:[#allocation2 + $0x10] sm:$0xff] %vm27_vm0, %v79_v34  ;;  %v101_v44 = vld [vmem:[#allocation2 + $0x20] sm:$0xff] }
  0xae   :  { %92 = vst.msk [vmem:[#allocation2 + $0x30] sm:$0xff] %vm27_vm0, %v83_v35  ;;  %v64_v39 = vpop.xlane.xlu0 %63 }
  0xaf   :  { %v76_v40 = vpop.xlane.xlu1 %75  ;;  %v80_v41 = vadd.f32 %v64_v39, %v39_v37 }
  0xb0   :  { %v84_v42 = vadd.f32 %v76_v40, %v43_v38  ;;  %v98_v43 = vld [vmem:[#allocation2 + $0x8] sm:$0xff] }
  0xb1   :  { %125 = vperm.xlu1 %218, %v98_v43   ;;  %89 = vst.msk [vmem:[#allocation2 + $0x18] sm:$0xff] %vm27_vm0, %v80_v41  ;;  %v102_v45 = vld [vmem:[#allocation2 + $0x28] sm:$0xff] }
  0xb2   :  { %93 = vst.msk [vmem:[#allocation2 + $0x38] sm:$0xff] %vm27_vm0, %v84_v42 }
  0xb4   :  { %v99_v46 = vld [vmem:[#allocation2 + $0x10] sm:$0xff] }
  0xb5   :  { %134 = vperm.xlu1 %218, %v101_v44   ;;  %v103_v47 = vld [vmem:[#allocation2 + $0x30] sm:$0xff] }
  0xb8   :  { %v100_v48 = vld [vmem:[#allocation2 + $0x18] sm:$0xff] }
  0xb9   :  { %137 = vperm.xlu1 %218, %v102_v45   ;;  %v104_v49 = vld [vmem:[#allocation2 + $0x38] sm:$0xff] }
  0xbd   :  { %128 = vperm.xlu1 %218, %v99_v46  }
  0xc1   :  { %140 = vperm.xlu1 %218, %v103_v47  }
  0xc5   :  { %131 = vperm.xlu1 %218, %v100_v48  }
  0xc9   :  { %143 = vperm.xlu1 %218, %v104_v49  }
 0x12c   :  { %v123_v1 = vpop.permute.xlu0 %122 }
 0x12d   :  { %v150_v7 = vrot.slane %v123_v1, %v149_v63 }
 0x130   :  { %v126_v50 = vpop.permute.xlu1 %125 }
 0x131   :  { %v155_v3 = vrot.slane %v126_v50, %v154_v61 }
 0x133   :  { %v157_v11 = vsel %vm156_vm2, %v155_v3, %v150_v7 }
 0x134   :  { %v135_v51 = vpop.permute.xlu1 %134 }
 0x135   :  { %v175_v8 = vrot.slane %v135_v51, %v149_v63 }
 0x138   :  { %v138_v53 = vpop.permute.xlu1 %137 }
 0x139   :  { %v179_v4 = vrot.slane %v138_v53, %v154_v61 }
 0x13b   :  { %v180_v12 = vsel %vm156_vm2, %v179_v4, %v175_v8 }
 0x13c   :  { %v129_v55 = vpop.permute.xlu1 %128 }
 0x13d   :  { %v162_v5 = vrot.slane %v129_v55, %v161_v62 }
 0x13f   :  { %v164_v14 = vsel %vm163_vm3, %v162_v5, %v157_v11 }
 0x140   :  { %v141_v60 = vpop.permute.xlu1 %140 }
 0x141   :  { %v184_v6 = vrot.slane %v141_v60, %v161_v62 }
 0x143   :  { %v185_v15 = vsel %vm163_vm3, %v184_v6, %v180_v12 }
 0x144   :  { %v132_v2 = vpop.permute.xlu1 %131 }
 0x145   :  { %v169_v9 = vrot.slane %v132_v2, %v168_v0 }
 0x147   :  { %v171_v16 = vsel %vm170_vm4, %v169_v9, %v164_v14 }
 0x148   :  { %v144_v10 = vpop.permute.xlu1 %143 }
 0x149   :  { %v189_v13 = vrot.slane %v144_v10, %v168_v0 }
 0x14b   :  { %v190_v17 = vsel %vm170_vm4, %v189_v13, %v185_v15 }
 0x14c   :  { %v192_v18 = vsel %vm191_vm5, %v190_v17, %v171_v16 }
 0x14d   :  { %195 = vst.msk [vmem:[#allocation6] sm:$0x3] %vm194_vm6, %v192_v18 }
 0x14e   :  { %252 = shalt.err (!%p249_p12)
}
 0x14f   :  { %s253_s24 = scalar_lea.hbm %s332_s1, 32 }
 0x150   :  { %p254_p13 = scmp.ne.s32.totalorder %s332_s1, %s253_s24  ;;  %p257_p0 = scmp.lt.u32.totalorder %s253_s24, %s332_s1 }
 0x152   :  { %p259_p1 = pnand %p257_p0, %p254_p13 }
 0x154   :  { %262 = shalt.err (!%p259_p1)
}
 0x155   :  { %205 = dma.vmem_to_hbm [thread:$0]  %s203_s20, 32, %s332_s1, [#allocation5]  }
 0x156   :  { %265 = dma.done.wait [#allocation5], 32  }
 0x157   :  { %266 = vsyncadd [#allocation5], 4294967264 }
 0x158   :  { %209 = vsyncpa [#allocation4], 1 }
 0x159   :  { %210 = vsyncpa [#allocation5], 1 }

</bundles_post_ra>
